<compile_context>
chip_gen: v5e
topology: v5e:2x2
jax: 0.10.0
libtpu: 0.0.40
codegen_flags: <defaults>
</compile_context>

<pallas_src>
import jax
import jax.numpy as jnp
from jax.experimental import pallas as pl
from jax.experimental.pallas import tpu as pltpu


def _chomp_copy_kernel(x_ref, o_ref):
    # Pure tile copy; the prefix slice is handled by the grid/index_map.
    o_ref[...] = x_ref[...]


def _round_up(x: int, m: int) -> int:
    return ((x + m - 1) // m) * m


_TILE_BYTE_BUDGET = 4 * 1024 * 1024   # ~4 MiB/tile: safe on v7x (64 MiB VMEM),
                                      # near-roofline on v5e/v6e as well.
_FAST_PATH_BYTES = 1 << 20            # below ~1 MiB output, XLA slice wins.


def chomp1d(x: jax.Array, chomp_size: int, *, force_pallas: bool = False) -> jax.Array:
    """Pallas equivalent of Chomp1d.forward: x[:, :, :-chomp_size]."""
    if chomp_size <= 0:
        raise ValueError("chomp_size must be positive (matches PyTorch slice)")
    n, c, l = x.shape
    l_out = l - chomp_size
    if l_out <= 0:
        raise ValueError("chomp_size must be smaller than the length dimension")

    itemsize = jnp.dtype(x.dtype).itemsize
    rows = n * c
    out_bytes = rows * l_out * itemsize

    # Small-input fast path: pallas_call launch + pipeline warm-up dwarfs the
    # copy for tiny activations; XLA's slice copy is already near roofline.
    if not force_pallas and out_bytes < _FAST_PATH_BYTES:
        return x[:, :, :l_out]

    # Free contiguous view for the default NCL layout (a non-default layout
    # would trigger one XLA copy here, outside the kernel).
    x2 = x.reshape(rows, l)

    # Sublane packing by dtype: f32 -> 8, bf16/f16 -> 16, int8/fp8 -> 32.
    sublane = {1: 32, 2: 16, 4: 8}.get(itemsize, 8)

    # --- Tile sizing by byte budget (dtype-independent ~4 MiB tiles) --------
    # Keep the row tile modest so the lane dim stays long: long contiguous
    # per-row DMA segments and dense unmasked vst on every full tile.
    tr = min(256, _round_up(rows, sublane))
    tl_budget = max(128, (_TILE_BYTE_BUDGET // (tr * itemsize)) // 128 * 128)
    tl = min(_round_up(l_out, 128), tl_budget)

    grid_r = pl.cdiv(rows, tr)
    grid_l = pl.cdiv(l_out, tl)

    # v7x megacore: with ("parallel","parallel") semantics the two TensorCores
    # split the grid; a single-tile grid would leave one core idle, so split
    # the larger axis once.  (No-op on single-TC v5e/v6e.)
    if grid_r * grid_l == 1:
        if rows >= 2 * sublane:
            tr = _round_up(pl.cdiv(rows, 2), sublane)
            grid_r = pl.cdiv(rows, tr)
        elif l_out >= 2 * 128:
            tl = _round_up(pl.cdiv(l_out, 2), 128)
            grid_l = pl.cdiv(l_out, tl)

    grid = (grid_r, grid_l)

    tile_bytes = tr * tl * itemsize
    # 2 (double-buffer) x 2 (in + out) live tiles + slack for compiler scratch.
    vmem_limit = int(4 * tile_bytes + 4 * 1024 * 1024)

    out2 = pl.pallas_call(
        _chomp_copy_kernel,
        out_shape=jax.ShapeDtypeStruct((rows, l_out), x.dtype),
        grid=grid,
        # Identical block shapes and index_maps for input and output: the grid
        # only walks the first l_out columns, so the chomped tail of the input
        # is never read.  The final partial L tile is masked automatically.
        in_specs=[pl.BlockSpec((tr, tl), lambda i, j: (i, j))],
        out_specs=pl.BlockSpec((tr, tl), lambda i, j: (i, j)),
        compiler_params=pltpu.CompilerParams(
            dimension_semantics=("parallel", "parallel"),
            vmem_limit_bytes=vmem_limit,
        ),
    )(x2)

    return out2.reshape(n, c, l_out)


if __name__ == "__main__":
    key = jax.random.PRNGKey(0)
    k1, k2 = jax.random.split(key)

    # 1) Tiny TCN-style activation, forced through the Pallas kernel
    #    (the auto path would take the XLA fast path at this size).
    N, C, L = 2, 4, 16
    chomp_size = 3
    x = jax.random.normal(k1, (N, C, L), dtype=jnp.float32)
    out = jax.block_until_ready(chomp1d(x, chomp_size, force_pallas=True))
    ref = x[:, :, :-chomp_size]
    assert out.shape == (N, C, L - chomp_size)
    assert out.dtype == x.dtype
    assert bool(jnp.all(out == ref))

    # 2) bf16 input with a partial lane tile (exercises dtype-aware sublane
    #    packing and byte-budget lane tiling), still forced through Pallas.
    N2, C2, L2, chomp2 = 2, 4, 300, 5
    xb = jax.random.normal(k2, (N2, C2, L2), dtype=jnp.bfloat16)
    outb = jax.block_until_ready(chomp1d(xb, chomp2, force_pallas=True))
    refb = xb[:, :, :-chomp2]
    assert outb.shape == (N2, C2, L2 - chomp2)
    assert outb.dtype == xb.dtype
    assert bool(jnp.all(outb == refb))

    # 3) Default (auto) path on the small input -> XLA fast path.
    out_fast = jax.block_until_ready(chomp1d(x, chomp_size))
    assert out_fast.shape == (N, C, L - chomp_size)
    assert bool(jnp.all(out_fast == ref))

    print("KERNEL_OK")
</pallas_src>

<mosaic_0001>
module attributes {stable_mosaic.version = 11 : i64} {
  func.func @_chomp_copy_kernel(%arg0: i32, %arg1: i32, %arg2: memref<8x128xf32, #tpu.memory_space<vmem>>, %arg3: memref<8x128xf32, #tpu.memory_space<vmem>>) attributes {dimension_semantics = [#tpu.dimension_semantics<parallel>, #tpu.dimension_semantics<parallel>], iteration_bounds = array<i64: 1, 1>, scalar_prefetch = 0 : i64, scratch_operands = 0 : i64, tpu.core_type = #tpu.core_type<tc>, window_params = [{transform_indices = @transform_0, window_bounds = array<i64: 8, 128>}, {transform_indices = @transform_1, window_bounds = array<i64: 8, 128>}]} {
    %c0 = arith.constant 0 : index
    %c0_0 = arith.constant 0 : index
    %0 = vector.load %arg2[%c0, %c0_0] : memref<8x128xf32, #tpu.memory_space<vmem>>, vector<8x128xf32>
    %c0_1 = arith.constant 0 : index
    %c0_2 = arith.constant 0 : index
    %1 = vector.load %arg3[%c0_1, %c0_2] : memref<8x128xf32, #tpu.memory_space<vmem>>, vector<8x128xf32>
    tpu.vector_store %arg3[%c0_1, %c0_2], %0 {strides = array<i32>} : memref<8x128xf32, #tpu.memory_space<vmem>>, vector<8x128xf32>,
    return
  }
  func.func @transform_0(%arg0: i32, %arg1: i32) -> (i32, i32) {
    %c0_i32 = arith.constant 0 : i32
    return %arg0, %arg1 : i32, i32
  }
  func.func @transform_1(%arg0: i32, %arg1: i32) -> (i32, i32) {
    %c0_i32 = arith.constant 0 : i32
    return %arg0, %arg1 : i32, i32
  }
}

</mosaic_0001>

<bundles_post_ra>
// kernel: tpu_custom_call.1
= control target key start
LH: loop header
LB: loop body
LE: loop exit
PB: predicated region body
PF: predicated region fallthrough
CT: control target
= control target key end

     0   :  { %6 = vsyncpa [#allocation3], 0  ;;  %s114_s0 = inlined_call_operand.hbm [shape: f32[8,16], index: 0, kind: input, shape index: {}]   ;;  %s115_s1 = inlined_call_operand.hbm [shape: f32[8,13], index: 1, kind: output, shape index: {}]  }
   0x1   :  { %7 = vsyncpa [#allocation4], 0  ;;  %s13_s8 = sshll.u32 %s114_s0, 4  ;;  %s96_s9 = smov [#allocation2]   ;;  %s14_s8 = int_to_ptr.hbm [resolvable:$true] %s13_s8 }
   0x2   :  { %s15_s10 = sshll.u32 %s96_s9, 4  ;;  %s16_s10 = int_to_ptr.vmem [resolvable:$true] %s15_s10 }
   0x3   :  { %18 = dma.hbm_to_vmem [thread:$0]  %s14_s8, 128, %s16_s10, [#allocation3]  }
   0x4   :  { %92 = dma.done.wait [#allocation3], 128  }
   0x5   :  { %93 = vsyncadd [#allocation3], 4294967168  ;;  %s97_s11 = smov [#allocation5]   ;;  %s32_s15 = sshll.u32 %s115_s1, 4  ;;  %v23_v0 = vld [vmem:[#allocation2] sm:$0xff]  ;;  %s33_s15 = int_to_ptr.hbm [resolvable:$true] %s32_s15 }
   0x6   :  { %s30_s12 = sshll.u32 %s97_s11, 4  ;;  %24 = vst [vmem:[#allocation5] sm:$0xff] %v23_v0  ;;  %s31_s12 = int_to_ptr.vmem [resolvable:$true] %s30_s12 }
   0x7   :  { %35 = dma.vmem_to_hbm [thread:$0]  %s31_s12, 128, %s33_s15, [#allocation4]  }
   0x8   :  { %94 = dma.done.wait [#allocation4], 128  }
   0x9   :  { %95 = vsyncadd [#allocation4], 4294967168 }
   0xa   :  { %40 = vsyncpa [#allocation3], 1 }
   0xb   :  { %41 = vsyncpa [#allocation4], 1 }

</bundles_post_ra>
